<compile_context>
chip_gen: v6e
topology: v6e:2x2x1
jax: 0.10.0
libtpu: 0.0.40
codegen_flags: <defaults>
</compile_context>

<pallas_src>
import math

import jax
import jax.numpy as jnp
from jax import lax
from jax.experimental import pallas as pl
from jax.experimental.pallas import tpu as pltpu

_EPS = 1e-5                       # PyTorch nn.GroupNorm default eps
_LANE = 128


def _vmem_capacity_bytes():
    try:
        cap = getattr(pltpu.get_tpu_info(), "vmem_capacity_bytes", None)
        if cap:
            return int(cap)
    except Exception:
        pass
    return 128 * 1024 * 1024


_VMEM_PHYS = _vmem_capacity_bytes()
# Leave headroom for double-buffered blocks + compiler scratch:
# ~48 MiB on v7x (64 MiB physical VMEM), 96 MiB on v5e/v6e (128 MiB physical VMEM).
_VMEM_LIMIT = min((_VMEM_PHYS * 3) // 4, 96 * 1024 * 1024)
# Larger tiles on 128 MiB parts -> fewer grid steps / less per-step overhead; stay conservative on v7x.
_TILE_BYTES = 4 * 1024 * 1024 if _VMEM_PHYS <= 64 * 1024 * 1024 else 12 * 1024 * 1024


def _spatial_tile(hw, c, dtype_bytes=4):
    """Largest lane-dense spatial tile dividing hw that keeps a (c, tile) f32 block under budget.

    Never returns a sub-128 tile unless the whole hw is taken as a single full-dim block.
    Callers pad hw to a multiple of 128 when it is large and not lane-aligned."""
    if c * hw * dtype_bytes <= _TILE_BYTES:
        return hw                                   # whole (full-dim) block — always legal
    max_t = max((_TILE_BYTES // (c * dtype_bytes)) // _LANE * _LANE, _LANE)
    t = min(max_t, (hw // _LANE) * _LANE)
    while t >= _LANE:
        if hw % t == 0:
            return t
        t -= _LANE
    return hw                                       # unaligned + over budget: callers avoid this


def _fits_fused(cg, hw, has_res):
    """Can the single-pass fused GN kernel hold a whole (cg, hw) slab (double-buffered) in VMEM?"""
    blk = cg * hw * 4
    n_big = 3 if has_res else 2                     # x (+res) + out
    need = n_big * 2 * blk + 2 * blk                # 2x pipeline buffers + in-kernel f32 temps
    return need <= int(_VMEM_LIMIT * 0.6)


def _silu(y):
    # TODO(synk): switch to pl.reciprocal(1+exp(-y), approx=True) (EUP slot) once activations
    # move to bf16; kept exact here so the f32 verification tolerance stays tight.
    return y * (1.0 / (1.0 + jnp.exp(-y)))


# ---------------------------------------------------------------------------
# Kernel A (main path): fully fused single-pass GroupNorm
#   stats (sum, sumsq) -> mean/rstd -> affine -> (+time-emb) -> SiLU -> (+residual)
# One HBM read of x, one HBM write of y, per (sample, group) slab.
# ---------------------------------------------------------------------------
def _make_gn_fused_kernel(count, eps, has_post, has_res):
    inv_count = 1.0 / float(count)

    def kernel(*refs):
        x_ref, gb_ref = refs[0], refs[1]
        i = 2
        post_ref = None
        res_ref = None
        if has_post:
            post_ref = refs[i]; i += 1
        if has_res:
            res_ref = refs[i]; i += 1
        o_ref = refs[i]

        x = x_ref[...].astype(jnp.float32)                       # (1, Cg, HW)
        # one load feeds BOTH moments (single-pass, f32 accumulation)
        s = jnp.sum(jnp.sum(x, axis=2, keepdims=True), axis=1, keepdims=True)       # (1,1,1)
        s2 = jnp.sum(jnp.sum(x * x, axis=2, keepdims=True), axis=1, keepdims=True)  # (1,1,1)
        mean = s * inv_count
        var = jnp.maximum(s2 * inv_count - mean * mean, 0.0)
        rstd = lax.rsqrt(var + eps)

        gb = gb_ref[...].astype(jnp.float32)                     # (1, Cg, 2) packed gamma/beta
        scale = gb[:, :, 0:1] * rstd                             # (1, Cg, 1)
        shift = gb[:, :, 1:2] - mean * scale

        y = _silu(x * scale + shift)
        if has_post:
            y = y + post_ref[...].astype(jnp.float32)            # (1, Cg, 1) time embedding
        if has_res:
            y = y + res_ref[...].astype(jnp.float32)
        o_ref[...] = y.astype(o_ref.dtype)

    return kernel


def _gn_fused(x3, gamma, beta, post, res3, groups, count, eps):
    n, c, hw = x3.shape
    cg = c // groups
    xg = x3.reshape(n * groups, cg, hw)
    gb = jnp.stack([gamma, beta], axis=-1).astype(jnp.float32).reshape(groups, cg, 2)

    has_post = post is not None
    has_res = res3 is not None

    x_spec = pl.BlockSpec((1, cg, hw), lambda i: (i, 0, 0))
    in_specs = [x_spec, pl.BlockSpec((1, cg, 2), lambda i: (i % groups, 0, 0))]
    args = [xg, gb]
    if has_post:
        in_specs.append(pl.BlockSpec((1, cg, 1), lambda i: (i, 0, 0)))
        args.append(post.astype(jnp.float32).reshape(n * groups, cg, 1))
    if has_res:
        in_specs.append(x_spec)
        args.append(res3.reshape(n * groups, cg, hw))

    # TODO(synk): when n*groups == 1 (single-sample sampling) one v7x TensorCore idles; a
    # channel-split two-core variant would need a cross-block stats exchange.
    out = pl.pallas_call(
        _make_gn_fused_kernel(count, eps, has_post, has_res),
        out_shape=jax.ShapeDtypeStruct((n * groups, cg, hw), x3.dtype),
        grid_spec=pltpu.PrefetchScalarGridSpec(
            num_scalar_prefetch=0,
            grid=(n * groups,),
            in_specs=in_specs,
            out_specs=x_spec,
        ),
        compiler_params=pltpu.CompilerParams(
            dimension_semantics=("parallel",),
            vmem_limit_bytes=_VMEM_LIMIT),
    )(*args)
    return out.reshape(n, c, hw)


# ---------------------------------------------------------------------------
# Fallback path (slab too big for VMEM): tiled single-pass stats + fused apply.
# ---------------------------------------------------------------------------
def _gn_stats_kernel(x_ref, sum_ref, sq_ref):
    @pl.when(pl.program_id(1) == 0)
    def _():
        sum_ref[...] = jnp.zeros_like(sum_ref)
        sq_ref[...] = jnp.zeros_like(sq_ref)

    x = x_ref[...].astype(jnp.float32)                      # (1, Cg, THW)
    s = jnp.sum(x, axis=2, keepdims=True)                   # lane reduce
    s2 = jnp.sum(x * x, axis=2, keepdims=True)
    sum_ref[...] += jnp.sum(s, axis=1, keepdims=True)       # sublane reduce -> (1,1,1)
    sq_ref[...] += jnp.sum(s2, axis=1, keepdims=True)


def _gn_stats(x3, groups):
    n, c, hw = x3.shape
    cg = c // groups
    xg = x3.reshape(n * groups, cg, hw)
    thw = _spatial_tile(hw, cg)
    grid = (n * groups, hw // thw)
    sum_, sq_ = pl.pallas_call(
        _gn_stats_kernel,
        out_shape=(jax.ShapeDtypeStruct((n * groups, 1, 1), jnp.float32),
                   jax.ShapeDtypeStruct((n * groups, 1, 1), jnp.float32)),
        grid_spec=pltpu.PrefetchScalarGridSpec(
            num_scalar_prefetch=0,
            grid=grid,
            in_specs=[pl.BlockSpec((1, cg, thw), lambda i, t: (i, 0, t))],
            out_specs=(pl.BlockSpec((1, 1, 1), lambda i, t: (i, 0, 0)),
                       pl.BlockSpec((1, 1, 1), lambda i, t: (i, 0, 0))),
        ),
        compiler_params=pltpu.CompilerParams(
            dimension_semantics=("parallel", "arbitrary"),
            vmem_limit_bytes=_VMEM_LIMIT),
    )(xg)
    return sum_.reshape(n, groups), sq_.reshape(n, groups)


def _make_gn_apply_kernel(has_post, has_res):
    def kernel(x_ref, ss_ref, *rest):
        if has_res:
            res_ref, o_ref = rest
        else:
            (o_ref,) = rest
        x = x_ref[...].astype(jnp.float32)                  # (1, C, THW)
        ss = ss_ref[...]                                    # (1, C, 2|3) packed scale/shift(/post)
        y = _silu(x * ss[:, :, 0:1] + ss[:, :, 1:2])
        if has_post:
            y = y + ss[:, :, 2:3]
        if has_res:
            y = y + res_ref[...].astype(jnp.float32)
        o_ref[...] = y.astype(o_ref.dtype)
    return kernel


def _gn_apply(x3, scale, shift, post, residual):
    n, c, hw = x3.shape
    thw = _spatial_tile(hw, c)
    if n == 1 and thw == hw and hw % (2 * _LANE) == 0:      # keep both v7x cores busy
        thw = hw // 2
    grid = (n, hw // thw)

    cols = [scale, shift] + ([post] if post is not None else [])
    ss = jnp.stack(cols, axis=-1).astype(jnp.float32)       # (n, c, 2|3)
    k = ss.shape[-1]

    x_spec = pl.BlockSpec((1, c, thw), lambda i, t: (i, 0, t))
    ss_spec = pl.BlockSpec((1, c, k), lambda i, t: (i, 0, 0))
    in_specs = [x_spec, ss_spec]
    args = [x3, ss]
    if residual is not None:
        in_specs.append(x_spec)
        args.append(residual)

    return pl.pallas_call(
        _make_gn_apply_kernel(post is not None, residual is not None),
        out_shape=jax.ShapeDtypeStruct((n, c, hw), x3.dtype),
        grid_spec=pltpu.PrefetchScalarGridSpec(
            num_scalar_prefetch=0,
            grid=grid,
            in_specs=in_specs,
            out_specs=x_spec,
        ),
        compiler_params=pltpu.CompilerParams(
            dimension_semantics=("parallel", "parallel"),
            vmem_limit_bytes=_VMEM_LIMIT),
    )(*args)


def fused_groupnorm_silu(x, gamma, beta, post=None, residual=None, groups=1, eps=_EPS):
    """GroupNorm(groups, C) -> affine -> SiLU -> (+post per-channel) -> (+residual), fused.

    Main path: ONE single-pass Pallas kernel per (sample, group). Fallback: tiled stats + apply."""
    n, c, h, w = x.shape
    hw = h * w
    cg = c // groups
    x3 = x.reshape(n, c, hw)
    res3 = residual.reshape(n, c, hw) if residual is not None else None

    # Lane-dense padding for awkward HW (e.g. 28x28 -> 784). Zero padding leaves sum / sumsq
    # untouched; the true element count is used for the mean, and the pad region is cropped.
    hw_pad = hw
    if hw > _LANE and hw % _LANE != 0:
        hw_pad = ((hw + _LANE - 1) // _LANE) * _LANE
        padding = ((0, 0), (0, 0), (0, hw_pad - hw))
        x3 = jnp.pad(x3, padding)
        if res3 is not None:
            res3 = jnp.pad(res3, padding)

    count = cg * hw

    if _fits_fused(cg, hw_pad, residual is not None):
        y3 = _gn_fused(x3, gamma, beta, post, res3, groups, count, eps)
    else:
        sum_, sq_ = _gn_stats(x3, groups)                       # (n, groups)
        mean = sum_ / count
        var = jnp.maximum(sq_ / count - mean * mean, 0.0)       # single-pass, clamped
        rstd = lax.rsqrt(var + eps)
        mean_c = jnp.repeat(mean, cg, axis=1)                   # (n, c)
        rstd_c = jnp.repeat(rstd, cg, axis=1)
        scale = rstd_c * gamma[None, :]
        shift = beta[None, :] - mean_c * scale
        y3 = _gn_apply(x3, scale, shift, post, res3)

    if hw_pad != hw:
        y3 = y3[:, :, :hw]
    return y3.reshape(n, c, h, w)


# ---------------------------------------------------------------------------
# Kernel B: 1x1 conv as per-sample channel matmul with lane-dense spatial tiles.
# Degenerate channel counts (C < 8, e.g. the final 1->1 conv) stay in XLA.
# ---------------------------------------------------------------------------
def _conv1x1_kernel(w_ref, b_ref, x_ref, o_ref):
    y = jnp.dot(w_ref[...], x_ref[...],                     # (C_out,C_in)@(C_in,THW) on MXU
                preferred_element_type=jnp.float32)
    y = y + b_ref[...]                                      # (C_out, 1) broadcast over lanes
    o_ref[...] = y.astype(o_ref.dtype)


def conv1x1(x, w, b):
    """1x1 conv (NCHW): x (N,Cin,H,W), w (Cout,Cin), b (Cout,) -> (N,Cout,H,W)."""
    n, c_in, h, wd = x.shape
    c_out = w.shape[0]
    hw = h * wd
    c_max = max(c_in, c_out)
    # MXU path only pays off with real channel counts and lane-friendly spatial extents.
    if min(c_in, c_out) < 8 or (hw % _LANE != 0 and c_max * hw * 4 > _TILE_BYTES):
        return _ref_conv1x1(x, w, b)

    x3 = x.reshape(n, c_in, hw)
    thw = _spatial_tile(hw, c_max)
    if n == 1 and thw == hw and hw % (2 * _LANE) == 0:      # keep both v7x cores busy
        thw = hw // 2
    grid = (n, hw // thw)
    out = pl.pallas_call(
        _conv1x1_kernel,
        out_shape=jax.ShapeDtypeStruct((n, c_out, hw), x.dtype),
        grid_spec=pltpu.PrefetchScalarGridSpec(
            num_scalar_prefetch=0,
            grid=grid,
            in_specs=[
                pl.BlockSpec((c_out, c_in), lambda i, t: (0, 0)),
                pl.BlockSpec((c_out, 1), lambda i, t: (0, 0)),
                pl.BlockSpec((None, c_in, thw), lambda i, t: (i, 0, t)),
            ],
            out_specs=pl.BlockSpec((None, c_out, thw), lambda i, t: (i, 0, t)),
        ),
        compiler_params=pltpu.CompilerParams(
            dimension_semantics=("parallel", "parallel"),
            vmem_limit_bytes=_VMEM_LIMIT),
    )(w, b.reshape(c_out, 1), x3)
    return out.reshape(n, c_out, h, wd)


# ---------------------------------------------------------------------------
# Pure-JAX references for the Pallas pieces (used for verification only).
# ---------------------------------------------------------------------------
def _ref_groupnorm_silu(x, gamma, beta, post=None, residual=None, groups=1, eps=_EPS):
    n, c, h, w = x.shape
    xg = x.reshape(n, groups, c // groups, h, w)
    mean = jnp.mean(xg, axis=(2, 3, 4), keepdims=True)
    var = jnp.mean((xg - mean) ** 2, axis=(2, 3, 4), keepdims=True)
    xn = ((xg - mean) * lax.rsqrt(var + eps)).reshape(n, c, h, w)
    y = xn * gamma[None, :, None, None] + beta[None, :, None, None]
    y = y * jax.nn.sigmoid(y)
    if post is not None:
        y = y + post[:, :, None, None]
    if residual is not None:
        y = y + residual
    return y


def _ref_conv1x1(x, w, b):
    return jnp.einsum("oi,nihw->nohw", w, x) + b[None, :, None, None]


# ---------------------------------------------------------------------------
# Plain-JAX building blocks kept in XLA.
# ---------------------------------------------------------------------------
# TODO(synk): spatial convolutions (7x7, 3x3, strided 4x4, transposed 4x4) have no clean
# Pallas win over XLA's MXU conv; they stay as lax.conv_general_dilated.
def conv2d(x, w, b, stride=1, padding=0):
    y = lax.conv_general_dilated(
        x, w, (stride, stride), [(padding, padding), (padding, padding)],
        dimension_numbers=("NCHW", "OIHW", "NCHW"))
    return y + b[None, :, None, None]


def conv_transpose2d(x, w, b, stride=2, padding=1):
    # w: (C_in, C_out, kh, kw) — PyTorch ConvTranspose2d layout.
    k = w.shape[2]
    w_f = jnp.flip(w, axis=(2, 3)).transpose(1, 0, 2, 3)    # (C_out, C_in, kh, kw)
    pad = k - 1 - padding
    y = lax.conv_general_dilated(
        x, w_f, (1, 1), [(pad, pad), (pad, pad)],
        lhs_dilation=(stride, stride),
        dimension_numbers=("NCHW", "OIHW", "NCHW"))
    return y + b[None, :, None, None]


def _sinusoidal_embedding(time, dim):
    half = dim // 2
    freq = jnp.exp(jnp.arange(half, dtype=jnp.float32) * (-math.log(10000.0) / (half - 1)))
    args = time.astype(jnp.float32)[:, None] * freq[None, :]
    return jnp.concatenate([jnp.sin(args), jnp.cos(args)], axis=-1)


# ---------------------------------------------------------------------------
# Parameter construction.
# ---------------------------------------------------------------------------
def _conv_params(key, c_out, c_in, k):
    wk, bk = jax.random.split(key)
    bound = 1.0 / math.sqrt(c_in * k * k)
    return {"w": jax.random.uniform(wk, (c_out, c_in, k, k), jnp.float32, -bound, bound),
            "b": jax.random.uniform(bk, (c_out,), jnp.float32, -bound, bound)}


def _convT_params(key, c_in, c_out, k):
    wk, bk = jax.random.split(key)
    bound = 1.0 / math.sqrt(c_out * k * k)
    return {"w": jax.random.uniform(wk, (c_in, c_out, k, k), jnp.float32, -bound, bound),
            "b": jax.random.uniform(bk, (c_out,), jnp.float32, -bound, bound)}


def _linear_params(key, d_out, d_in):
    wk, bk = jax.random.split(key)
    bound = 1.0 / math.sqrt(d_in)
    return {"w": jax.random.uniform(wk, (d_out, d_in), jnp.float32, -bound, bound),
            "b": jax.random.uniform(bk, (d_out,), jnp.float32, -bound, bound)}


def _block_params(key, c_in, c_out):
    return {"proj": _conv_params(key, c_out, c_in, 3),
            "gamma": jnp.ones((c_out,), jnp.float32),
            "beta": jnp.zeros((c_out,), jnp.float32)}


def _resnet_params(key, c_in, c_out, t_dim):
    k1, k2, k3, k4 = jax.random.split(key, 4)
    return {"block1": _block_params(k1, c_in, c_out),
            "block2": _block_params(k2, c_out, c_out),
            "time": _linear_params(k3, c_out, t_dim),
            "res_conv": _linear_params(k4, c_out, c_in) if c_in != c_out else None}


# ---------------------------------------------------------------------------
# Block / ResnetBlock / Unet forward.
# TODO(synk): ResnetBlock / Block / SinusoidalPositionEmbeddings bodies are assumed
# (conv3x3 -> GroupNorm(1, C) -> SiLU, time embedding added after block1) since
# Inspiration/modules_online.py is not part of the provided spec.
# ---------------------------------------------------------------------------
def _block_forward(p, x, post, residual, use_pallas):
    h = conv2d(x, p["proj"]["w"], p["proj"]["b"], stride=1, padding=1)
    if use_pallas:
        return fused_groupnorm_silu(h, p["gamma"], p["beta"], post=post, residual=residual)
    return _ref_groupnorm_silu(h, p["gamma"], p["beta"], post=post, residual=residual)


def _resnet_forward(p, x, t, use_pallas):
    temb = jax.nn.silu(t) @ p["time"]["w"].T + p["time"]["b"]          # (N, C_out)
    # block1: conv -> fused [GN stats + affine + SiLU + temb-add] (single pass over x)
    h = _block_forward(p["block1"], x, post=temb, residual=None, use_pallas=use_pallas)
    # residual path (1x1 conv on the MXU when channel counts are non-degenerate)
    if p["res_conv"] is not None:
        if use_pallas:
            r = conv1x1(x, p["res_conv"]["w"], p["res_conv"]["b"])
        else:
            r = _ref_conv1x1(x, p["res_conv"]["w"], p["res_conv"]["b"])
    else:
        r = x
    # block2: conv -> fused [GN stats + affine + SiLU + residual-add] (single pass)
    return _block_forward(p["block2"], h, post=None, residual=r, use_pallas=use_pallas)


class Unet:
    def __init__(self, dims, time_dim=200, channels=1, *, key):
        self.dims, self.time_dim, self.channels = dims, time_dim, channels
        keys = iter(jax.random.split(key, 64))
        td4 = 4 * time_dim
        self.time_mlp = {"lin1": _linear_params(next(keys), td4, time_dim),
                         "lin2": _linear_params(next(keys), td4, td4)}
        self.init_conv = _conv_params(next(keys), dims[0][0], channels, 7)
        self.encoder, self.decoder = [], []
        for i, (d_in, d_out) in enumerate(dims):
            b1 = _resnet_params(next(keys), d_in, d_out, td4)
            b2 = _resnet_params(next(keys), d_out, d_out, td4)
            down = _conv_params(next(keys), d_out, d_out, 4) if i != len(dims) - 1 else None
            self.encoder.append((b1, b2, down))
        for i, (d_in, d_out) in enumerate(reversed(dims)):
            b1 = _resnet_params(next(keys), 2 * d_out, d_in, td4)
            b2 = _resnet_params(next(keys), d_in, d_in, td4)
            up = _convT_params(next(keys), d_in, d_in, 4) if i != len(dims) - 1 else None
            self.decoder.append((b1, b2, up))
        mid = dims[-1][-1]
        self.mid1 = _resnet_params(next(keys), mid, mid, td4)
        self.mid2 = _resnet_params(next(keys), mid, mid, td4)
        self.final_block = _resnet_params(next(keys), dims[0][0], channels, td4)
        self.final_conv = _linear_params(next(keys), channels, channels)   # 1x1 conv

    def _time_mlp_forward(self, time):
        emb = _sinusoidal_embedding(time, self.time_dim)
        h = emb @ self.time_mlp["lin1"]["w"].T + self.time_mlp["lin1"]["b"]
        h = jax.nn.gelu(h, approximate=False)
        return h @ self.time_mlp["lin2"]["w"].T + self.time_mlp["lin2"]["b"]

    def __call__(self, x, time, use_pallas=True):
        x = conv2d(x, self.init_conv["w"], self.init_conv["b"], padding=3)
        t = self._time_mlp_forward(time)
        res = []
        for b1, b2, down in self.encoder:
            x = _resnet_forward(b1, x, t, use_pallas)
            x = _resnet_forward(b2, x, t, use_pallas)
            res.append(x)
            if down is not None:
                x = conv2d(x, down["w"], down["b"], stride=2, padding=1)
        x = _resnet_forward(self.mid1, x, t, use_pallas)
        x = _resnet_forward(self.mid2, x, t, use_pallas)
        for b1, b2, up in self.decoder:
            x = jnp.concatenate([x, res.pop()], axis=1)
            x = _resnet_forward(b1, x, t, use_pallas)
            x = _resnet_forward(b2, x, t, use_pallas)
            if up is not None:
                x = conv_transpose2d(x, up["w"], up["b"], stride=2, padding=1)
        x = _resnet_forward(self.final_block, x, t, use_pallas)
        # Final 1->1-channel conv: degenerate for the MXU, handled by XLA inside conv1x1's bypass
        # (and directly on the reference path).
        if use_pallas:
            return conv1x1(x, self.final_conv["w"], self.final_conv["b"])
        return _ref_conv1x1(x, self.final_conv["w"], self.final_conv["b"])


if __name__ == "__main__":
    key = jax.random.PRNGKey(0)
    k_param, k_x = jax.random.split(key)

    N, channels, H, W = 2, 1, 16, 16
    dims = [(8, 16), (16, 32)]
    time_dim = 8

    model = Unet(dims, time_dim=time_dim, channels=channels, key=k_param)
    x = jax.random.normal(k_x, (N, channels, H, W), jnp.float32)
    time = jnp.array([3.0, 11.0], jnp.float32)

    y = model(x, time, use_pallas=True)
    y = jax.block_until_ready(y)

    # Verify the Pallas path against the pure-JAX reference path (same params).
    y_ref = jax.block_until_ready(model(x, time, use_pallas=False))
    assert y.shape == (N, channels, H, W)
    err = float(jnp.max(jnp.abs(y - y_ref)))
    assert err < 2e-3, f"mismatch vs reference: {err}"

    print("KERNEL_OK")
</pallas_src>

<mosaic_0001>
module attributes {stable_mosaic.version = 11 : i64} {
  func.func @kernel(%arg0: i32, %arg1: memref<1x16x256xf32, #tpu.memory_space<vmem>>, %arg2: memref<1x16x2xf32, #tpu.memory_space<vmem>>, %arg3: memref<1x16x1xf32, #tpu.memory_space<vmem>>, %arg4: memref<1x16x256xf32, #tpu.memory_space<vmem>>) attributes {dimension_semantics = [#tpu.dimension_semantics<parallel>], iteration_bounds = array<i64: 2>, scalar_prefetch = 0 : i64, scratch_operands = 0 : i64, tpu.core_type = #tpu.core_type<tc>, window_params = [{transform_indices = @transform_0, window_bounds = array<i64: 1, 16, 256>}, {transform_indices = @transform_1, window_bounds = array<i64: 1, 16, 2>}, {transform_indices = @transform_2, window_bounds = array<i64: 1, 16, 1>}, {transform_indices = @transform_3, window_bounds = array<i64: 1, 16, 256>}]} {
    %c0 = arith.constant 0 : index
    %c0_0 = arith.constant 0 : index
    %c0_1 = arith.constant 0 : index
    %0 = vector.load %arg1[%c0, %c0_0, %c0_1] : memref<1x16x256xf32, #tpu.memory_space<vmem>>, vector<1x16x256xf32>
    %cst = arith.constant dense<0.000000e+00> : vector<1x16xf32>
    %1 = vector.multi_reduction <add>, %0, %cst [2] : vector<1x16x256xf32> to vector<1x16xf32>
    %2 = vector.shape_cast %1 : vector<1x16xf32> to vector<1x16x1xf32>
    %cst_2 = arith.constant dense<0.000000e+00> : vector<1x1xf32>
    %3 = vector.multi_reduction <add>, %2, %cst_2 [1] : vector<1x16x1xf32> to vector<1x1xf32>
    %4 = vector.shape_cast %3 : vector<1x1xf32> to vector<1x1x1xf32>
    %5 = arith.mulf %0, %0 : vector<1x16x256xf32>
    %cst_3 = arith.constant dense<0.000000e+00> : vector<1x16xf32>
    %6 = vector.multi_reduction <add>, %5, %cst_3 [2] : vector<1x16x256xf32> to vector<1x16xf32>
    %7 = vector.shape_cast %6 : vector<1x16xf32> to vector<1x16x1xf32>
    %cst_4 = arith.constant dense<0.000000e+00> : vector<1x1xf32>
    %8 = vector.multi_reduction <add>, %7, %cst_4 [1] : vector<1x16x1xf32> to vector<1x1xf32>
    %9 = vector.shape_cast %8 : vector<1x1xf32> to vector<1x1x1xf32>
    %cst_5 = arith.constant 2.44140625E-4 : f32
    %10 = vector.broadcast %cst_5 : f32 to vector<1x1x1xf32>
    %11 = arith.mulf %4, %10 : vector<1x1x1xf32>
    %cst_6 = arith.constant 2.44140625E-4 : f32
    %12 = vector.broadcast %cst_6 : f32 to vector<1x1x1xf32>
    %13 = arith.mulf %9, %12 : vector<1x1x1xf32>
    %14 = arith.mulf %11, %11 : vector<1x1x1xf32>
    %15 = arith.subf %13, %14 : vector<1x1x1xf32>
    %cst_7 = arith.constant 0.000000e+00 : f32
    %16 = vector.broadcast %cst_7 : f32 to vector<1x1x1xf32>
    %17 = arith.maximumf %15, %16 : vector<1x1x1xf32>
    %cst_8 = arith.constant 9.99999974E-6 : f32
    %18 = vector.broadcast %cst_8 : f32 to vector<1x1x1xf32>
    %19 = arith.addf %17, %18 : vector<1x1x1xf32>
    %20 = math.rsqrt %19 : vector<1x1x1xf32>
    %c0_9 = arith.constant 0 : index
    %c0_10 = arith.constant 0 : index
    %c0_11 = arith.constant 0 : index
    %21 = vector.load %arg2[%c0_9, %c0_10, %c0_11] : memref<1x16x2xf32, #tpu.memory_space<vmem>>, vector<1x16x2xf32>
    %22 = vector.extract_strided_slice %21 {offsets = [0, 0, 0], sizes = [1, 16, 1], strides = [1, 1, 1]} : vector<1x16x2xf32> to vector<1x16x1xf32>
    %23 = vector.broadcast %20 : vector<1x1x1xf32> to vector<1x16x1xf32>
    %24 = arith.mulf %22, %23 : vector<1x16x1xf32>
    %25 = vector.extract_strided_slice %21 {offsets = [0, 0, 1], sizes = [1, 16, 1], strides = [1, 1, 1]} : vector<1x16x2xf32> to vector<1x16x1xf32>
    %26 = vector.broadcast %11 : vector<1x1x1xf32> to vector<1x16x1xf32>
    %27 = arith.mulf %26, %24 : vector<1x16x1xf32>
    %28 = arith.subf %25, %27 : vector<1x16x1xf32>
    %29 = vector.broadcast %24 : vector<1x16x1xf32> to vector<1x16x256xf32>
    %30 = arith.mulf %0, %29 : vector<1x16x256xf32>
    %31 = vector.broadcast %28 : vector<1x16x1xf32> to vector<1x16x256xf32>
    %32 = arith.addf %30, %31 : vector<1x16x256xf32>
    %cst_12 = arith.constant 0.000000e+00 : f32
    %33 = vector.broadcast %cst_12 : f32 to vector<1x16x256xf32>
    %34 = arith.subf %33, %32 : vector<1x16x256xf32>
    %35 = math.exp %34 : vector<1x16x256xf32>
    %cst_13 = arith.constant 1.000000e+00 : f32
    %36 = vector.broadcast %cst_13 : f32 to vector<1x16x256xf32>
    %37 = arith.addf %36, %35 : vector<1x16x256xf32>
    %cst_14 = arith.constant 1.000000e+00 : f32
    %38 = vector.broadcast %cst_14 : f32 to vector<1x16x256xf32>
    %39 = arith.divf %38, %37 : vector<1x16x256xf32>
    %40 = arith.mulf %32, %39 : vector<1x16x256xf32>
    %c0_15 = arith.constant 0 : index
    %c0_16 = arith.constant 0 : index
    %c0_17 = arith.constant 0 : index
    %41 = vector.load %arg3[%c0_15, %c0_16, %c0_17] : memref<1x16x1xf32, #tpu.memory_space<vmem>>, vector<1x16x1xf32>
    %42 = vector.broadcast %41 : vector<1x16x1xf32> to vector<1x16x256xf32>
    %43 = arith.addf %40, %42 : vector<1x16x256xf32>
    %c0_18 = arith.constant 0 : index
    %c0_19 = arith.constant 0 : index
    %c0_20 = arith.constant 0 : index
    %44 = vector.load %arg4[%c0_18, %c0_19, %c0_20] : memref<1x16x256xf32, #tpu.memory_space<vmem>>, vector<1x16x256xf32>
    tpu.vector_store %arg4[%c0_18, %c0_19, %c0_20], %43 {strides = array<i32>} : memref<1x16x256xf32, #tpu.memory_space<vmem>>, vector<1x16x256xf32>,
    return
  }
  func.func @transform_0(%arg0: i32) -> (i32, i32, i32) {
    %c0_i32 = arith.constant 0 : i32
    %c0_i32_0 = arith.constant 0 : i32
    %c0_i32_1 = arith.constant 0 : i32
    return %arg0, %c0_i32, %c0_i32_0 : i32, i32, i32
  }
  func.func @transform_1(%arg0: i32) -> (i32, i32, i32) {
    %c1_i32 = arith.constant 1 : i32
    %c0_i32 = arith.constant 0 : i32
    %0 = arith.cmpi eq, %c1_i32, %c0_i32 : i32
    %c1_i32_0 = arith.constant 1 : i32
    %1 = arith.select %0, %c1_i32_0, %c1_i32 : i32
    %2 = arith.remsi %arg0, %1 : i32
    %c0_i32_1 = arith.constant 0 : i32
    %3 = arith.cmpi ne, %2, %c0_i32_1 : i32
    %c0_i32_2 = arith.constant 0 : i32
    %4 = arith.cmpi slt, %2, %c0_i32_2 : i32
    %c0_i32_3 = arith.constant 0 : i32
    %5 = arith.cmpi slt, %1, %c0_i32_3 : i32
    %6 = arith.xori %4, %5 : i1
    %7 = arith.andi %6, %3 : i1
    %8 = arith.addi %2, %1 : i32
    %9 = arith.select %7, %8, %2 : i32
    %c0_i32_4 = arith.constant 0 : i32
    %c0_i32_5 = arith.constant 0 : i32
    %c0_i32_6 = arith.constant 0 : i32
    return %9, %c0_i32_4, %c0_i32_5 : i32, i32, i32
  }
  func.func @transform_2(%arg0: i32) -> (i32, i32, i32) {
    %c0_i32 = arith.constant 0 : i32
    %c0_i32_0 = arith.constant 0 : i32
    %c0_i32_1 = arith.constant 0 : i32
    return %arg0, %c0_i32, %c0_i32_0 : i32, i32, i32
  }
  func.func @transform_3(%arg0: i32) -> (i32, i32, i32) {
    %c0_i32 = arith.constant 0 : i32
    %c0_i32_0 = arith.constant 0 : i32
    %c0_i32_1 = arith.constant 0 : i32
    return %arg0, %c0_i32, %c0_i32_0 : i32, i32, i32
  }
}

</mosaic_0001>

<bundles_post_ra>
// kernel: tpu_custom_call.1
= control target key start
LH: loop header
LB: loop body
LE: loop exit
PB: predicated region body
PF: predicated region fallthrough
CT: control target
= control target key end

     0   :  { %8 = vsyncpa [#allocation3], 0  ;;  %s852_s0 = inlined_call_operand.hbm [shape: f32[2,16,256], index: 0, kind: input, shape index: {}]   ;;  %s853_s1 = inlined_call_operand.vmem [shape: f32[1,16,2], index: 1, kind: input, shape index: {}]   ;;  %s854_s2 = inlined_call_operand.vmem [shape: f32[2,16,1], index: 2, kind: input, shape index: {}]   ;;  %s855_s3 = inlined_call_operand.hbm [shape: f32[2,16,256], index: 3, kind: output, shape index: {}]  }
   0x1   :  { %10 = vsyncpa [#allocation3 + $0x1], 0 }
   0x2   :  { %11 = vsyncpa [#allocation4], 0 }
   0x3   :  { %13 = vsyncpa [#allocation4 + $0x1], 0  ;;  %s659_s12 = smov 0   ;;  %s661_s13 = smov 0  }
   0x4   :  { %s663_s14 = smov 0   ;;  %s665_s15 = smov 0  }
   0x5 LB: > { %s680_s16 = sadd.s32 4294967295, %s628_s15   ;;  %s441_s17 = sadd.s32 4294967294, %s628_s15   ;;  %s628_s15 = sphi %s665_s15, %s870_s15   ;;  %s624_s14 = sphi %s663_s14, %s869_s14   ;;  %s620_s13 = sphi %s661_s13, %s868_s13   ;;  %s616_s12 = sphi %s659_s12, %s867_s12  }
   0x6   : > { %s684_s18 = sadd.s32 1, %s628_s15   ;;  %s26_s19 = sadd.s32 1, %s624_s14 }
   0x7   : > { %s23_s20 = ssub.s32 %s628_s15, %s684_s18  ;;  %p33_p0 = scmp.ne.s32.totalorder %s624_s14, %s620_s13 }
   0x8   : > { %p24_p1 = scmp.eq.s32.totalorder %s23_s20, 0  ;;  %p34_p2 = scmp.eq.s32.totalorder %s628_s15, 0 }
   0x9   : > { %p39_p3 = scmp.ne.s32.totalorder %s620_s13, %s616_s12  ;;  %p40_p4 = scmp.eq.s32.totalorder %s680_s16, 0 }
   0xa   : > { %s696_s21 = scalar_select %p24_p1, %s624_s14, %s26_s19  }
   0xb   : > { %p698_p5 = por %p34_p2, %p33_p0  ;;  %p702_p6 = por %p40_p4, %p39_p3 }
   0xc   : > { %p110_p7 = scmp.eq.s32.totalorder %s680_s16, 1  ;;  %p116_p8 = scmp.eq.s32.totalorder %s441_s17, 1 }
   0xd   : > { %s859_s23 = scalar_select %p702_p6, 1, 0 }
   0xe   : > { %p472_p10 = scmp.lt.s32.totalorder %s628_s15, 2  ;;  %p709_p11 = por %p110_p7, %p33_p0 }
   0xf   : > { %p713_p12 = por %p116_p8, %p39_p3  ;;  %s139_s26 = sand.u32 1, %s624_s14  }
  0x10   : > { %s860_s24 = scalar_select %p709_p11, 1, 0 }
  0x11   : > { %s861_s25 = scalar_select %p713_p12, 1, 0 }
  0x12   : > { %s457_s27 = sshll.u32 %s628_s15, 9  ;;  %s444_s28 = sshll.u32 %s139_s26, 5 }
  0x13   : > { %s722_s4 = scalar_lea.hbm %s852_s0, %s457_s27  ;;  %s143_s5 = scalar_lea.vmem [#allocation2], %s444_s28 }
  0x14   : > { %s150_s6 = sshll.u32 %s143_s5, 4  ;;  %p726_p13 = pnand %p472_p10, %p698_p5  ;;  %s730_s6 = int_to_ptr.vmem [resolvable:$true] %s150_s6 }
  0x15   : > { %s732_s8 = scalar_lea.sflag [#allocation3], %s139_s26  ;;  %s536_s9 = scalar_lea.hbm %s722_s4, 512 }
  0x16   : > { %p537_p0 = scmp.ne.s32.totalorder %s722_s4, %s536_s9  ;;  %p538_p1 = pneg %p726_p13 }
  0x17   : > { %s541_s17 = scalar_lea.hbm %s852_s0, 1024  ;;  %p542_p4 = scmp.lt.s32.totalorder %s722_s4, %s852_s0 }
  0x18   : > { %p539_p2 = pnand %p538_p1, %p537_p0  ;;  %p543_p5 = scmp.lt.s32.totalorder %s541_s17, %s536_s9 }
  0x1a   : > { %p540_p3 = pneg %p539_p2  ;;  %p544_p7 = por %p543_p5, %p542_p4 }
  0x1c   : > { %p545_p8 = pnand %p544_p7, %p540_p3 }
  0x1e   : > { %548 = shalt.err (!%p545_p8)
}
  0x1f   : > { %s549_s22 = scalar_lea.vmem %s730_s6, 512  ;;  %s630_s26 = smov [#allocation2]  }
  0x20   : > { %p550_p10 = scmp.ne.s32.totalorder %s730_s6, %s549_s22  ;;  %s554_s27 = sshll.u32 %s630_s26, 4  ;;  %s555_s27 = int_to_ptr.vmem [resolvable:$false] %s554_s27 }
  0x21   : > { %s556_s28 = scalar_lea.vmem %s555_s27, 1024  ;;  %p557_p2 = scmp.lt.s32.totalorder %s730_s6, %s555_s27 }
  0x22   : > { %p552_p9 = pnand %p550_p10, %p538_p1  ;;  %p558_p12 = scmp.lt.s32.totalorder %s556_s28, %s549_s22 }
  0x24   : > { %p553_p0 = pneg %p552_p9  ;;  %p559_p11 = por %p558_p12, %p557_p2 }
  0x26   : > { %p560_p6 = pnand %p559_p11, %p553_p0 }
  0x28   : > { %563 = shalt.err (!%p560_p6)
}
  0x29   : > { %s631_s29 = smov 256   ;;  %s632_s30 = smov 16  }
  0x2a   : > { %467 = dma.hbm_to_vmem [thread:$0]  (!%p726_p13), %s722_s4, 512, %s730_s6, %s732_s8, %s631_s29, %s631_s29, %s632_s30  }
  0x2b   : > { %p447_p9 = scmp.ge.s32.totalorder %s628_s15, 1  ;;  %p166_p1 = scmp.lt.s32.totalorder %s628_s15, 3 }
  0x2d   : > { %p167_p3 = pnand %p447_p9, %p166_p1 }
  0x2e   : > { %s756_s5 = sand.u32 (!%p167_p3), 1, %s620_s13   ;;  %p863_p6 = scmp.ne.s32.totalorder (!%p167_p3), %s859_s23, 0 }
  0x2f   : > { %170 = sbr.rel (%p167_p3) target bundleno = 538 (0x21a), region = 32  ;;  %s448_s9 = sshll.u32 (!%p167_p3), %s756_s5, 5 }
  0x30   : > { %s173_s10 = scalar_lea.sflag (!%p167_p3), [#allocation3], %s756_s5  ;;  %s176_s11 = scalar_lea.vmem (!%p167_p3), [#allocation2], %s448_s9 }
  0x34   : > { %607 = dma.done.wait (%p863_p6), %s173_s10, 512  }
  0x35   : > { %609 = vsyncadd (%p863_p6), %s173_s10, 4294966784  ;;  %v766_v0 = vld [vmem:[%s176_s11] sm:$0xff]  ;;  %v768_v1 = vld [vmem:[%s176_s11 + $0x8] sm:$0xff]  ;;  %v633_v12 = vmov 0   ;;  %v634_v37 = vmov 1   ;;  %s635_s8 = smov 1  }
  0x36   : > { %v770_v2 = vld [vmem:[%s176_s11 + $0x10] sm:$0xff]  ;;  %v213_v3 = vadd.f32 %v768_v1, %v766_v0  ;;  %v226_v4 = vmul.f32 %v766_v0, %v766_v0  ;;  %v227_v5 = vmul.f32 %v768_v1, %v768_v1  ;;  %v778_v6 = vld [vmem:[%s176_s11 + $0x18] sm:$0xff]  ;;  %513 = vset.pattern.permute.xlu1 %v633_v12  ;;  %514 = vset.pattern.permute.xlu0 %v634_v37  ;;  %v251_v38 = vld [vmem:[%s853_s1 + $0x8] sm:$0xff]  ;;  %p204_p11 = scmp.lt.s32.totalorder %s680_s16, 1  ;;  %s203_s27 = scalar_lea.vmem [#allocation5], %s448_s9 }
  0x37   : > { %v228_v7 = vmul.f32 %v770_v2, %v770_v2  ;;  %v229_v8 = vmul.f32 %v778_v6, %v778_v6  ;;  %v216_v10 = vadd.f32 %v778_v6, %v770_v2  ;;  %v250_v39 = vld [vmem:[%s853_s1] sm:$0xff]  ;;  %s356_s28 = sshll.u32 %s203_s27, 4  ;;  %s459_s29 = sshll.u32 %s680_s16, 9  ;;  %s804_s28 = int_to_ptr.vmem [resolvable:$true] %s356_s28 }
  0x38   : > { %214 = vadd.xlane.f32.xlu0 %v213_v3  ;;  %v230_v9 = vadd.f32 %v227_v5, %v226_v4  ;;  %s205_s17 = scalar_select %p204_p11, %s680_s16, 1 }
  0x39   : > { %v233_v11 = vadd.f32 %v229_v8, %v228_v7  ;;  %s809_s10 = scalar_lea.hbm %s855_s3, %s459_s29  ;;  %s343_s16 = scalar_lea.sflag [#allocation4], %s756_s5 }
  0x3a   : > { %231 = vadd.xlane.f32.xlu1 %v230_v9  ;;  %s458_s19 = sshll.u32 %s205_s17, 4  ;;  %s564_s11 = scalar_lea.vmem %s804_s28, 512 }
  0x3b   : > { %s208_s26 = scalar_lea.vmem %s854_s2, %s458_s19  ;;  %p565_p12 = scmp.ne.s32.totalorder %s804_s28, %s564_s11 }
  0x3c   : > { %217 = vadd.xlane.f32.xlu0 %v216_v10  ;;  %v322_v49 = vld [vmem:[%s208_s26] sm:$0xff]  ;;  %v323_v50 = vld [vmem:[%s208_s26 + $0x8] sm:$0xff]  ;;  %p864_p13 = scmp.ne.s32.totalorder %s860_s24, 0  ;;  %s636_s23 = smov [#allocation5]  }
  0x3d   : > { %s568_s4 = sshll.u32 %s636_s23, 4  ;;  %s569_s4 = int_to_ptr.vmem [resolvable:$false] %s568_s4 }
  0x3e   : > { %234 = vadd.xlane.f32.xlu1 %v233_v11  ;;  %p566_p4 = pnand %p565_p12, %p864_p13  ;;  %s570_s6 = scalar_lea.vmem %s569_s4, 1024 }
  0x3f   : > { %p571_p7 = scmp.lt.s32.totalorder %s804_s28, %s569_s4  ;;  %p572_p8 = scmp.lt.s32.totalorder %s570_s6, %s564_s11 }
  0x40   : > { %p567_p5 = pneg %p566_p4 }
  0x41   : > { %p573_p10 = por %p572_p8, %p571_p7 }
  0x43   : > { %p574_p0 = pnand %p573_p10, %p567_p5 }
  0xc1   : > { %v215_v13 = vpop.xlane.xlu0 %214 }
  0xc3   : > { %v232_v14 = vpop.xlane.xlu1 %231 }
  0xc5   : > { %v218_v15 = vpop.xlane.xlu0 %217 }
  0xc6   : > { %v219_v16 = vadd.f32 %v218_v15, %v215_v13 }
  0xc7   : > { %v235_v17 = vpop.xlane.xlu1 %234 }
  0xc8   : > { %v220_v18 = vrot.slane %v219_v16, 4  ;;  %v236_v19 = vadd.f32 %v235_v17, %v232_v14 }
  0xca   : > { %v221_v20 = vadd.f32 %v220_v18, %v219_v16  ;;  %v237_v21 = vrot.slane %v236_v19, 4 }
  0xcc   : > { %v222_v22 = vrot.slane %v221_v20, 2  ;;  %v238_v23 = vadd.f32 %v237_v21, %v236_v19 }
  0xce   : > { %v223_v24 = vadd.f32 %v222_v22, %v221_v20  ;;  %v239_v25 = vrot.slane %v238_v23, 2 }
  0xd0   : > { %v224_v26 = vrot.slane %v223_v24, 1  ;;  %v240_v27 = vadd.f32 %v239_v25, %v238_v23 }
  0xd2   : > { %v225_v28 = vadd.f32 %v224_v26, %v223_v24  ;;  %v241_v29 = vrot.slane %v240_v27, 1 }
  0xd4   : > { %v243_v30 = vmul.f32 0.00024414063, %v225_v28  ;;  %v242_v31 = vadd.f32 %v241_v29, %v240_v27 }
  0xd6   : > { %v244_v32 = vmul.f32 0.00024414063, %v242_v31  ;;  %v245_v33 = vmul.f32 %v243_v30, %v243_v30 }
  0xd8   : > { %v246_v34 = vsub.f32 %v244_v32, %v245_v33 }
  0xda   : > { %v247_v35 = vmax.f32 %v246_v34, 0.0 }
  0xdc   : > { %v248_v36 = vadd.f32 1e-05, %v247_v35 }
  0xde   : > { %518 = vrsqrt.f32 %v248_v36 }
  0xeb   : > { %v519_v40 = vpop.eup %518 }
  0xec   : > { %v253_v41 = vmul.f32 %v519_v40, %v251_v38  ;;  %v252_v42 = vmul.f32 %v519_v40, %v250_v39 }
  0xee   : > { %v255_v43 = vmul.f32 %v253_v41, %v243_v30  ;;  %v254_v44 = vmul.f32 %v252_v42, %v243_v30 }
  0xf0   : > { %260 = vrot.lane.b32.xlu1 %v255_v43, %s635_s8  ;;  %258 = vrot.lane.b32.xlu0 %v254_v44, %s635_s8 }
  0xf4   : > { %268 = vperm.xlu1 %513, %v252_v42  }
  0xf8   : > { %273 = vperm.xlu1 %513, %v253_v41  }
  0xfc   : > { %515 = vset.pattern.permute.xlu1 %v634_v37 }
 0x162   : > { %v261_v45 = vpop.permute.xlu1 %260  ;;  %v259_v46 = vpop.permute.xlu0 %258 }
 0x163   : > { %v265_v47 = vsub.f32 %v251_v38, %v261_v45  ;;  %v264_v48 = vsub.f32 %v250_v39, %v259_v46 }
 0x165   : > { %287 = vperm.xlu1 %515, %v265_v47   ;;  %282 = vperm.xlu0 %514, %v264_v48  }
 0x169   : > { %516 = vset.pattern.permute.xlu1 %v633_v12  ;;  %517 = vset.pattern.permute.xlu0 %v633_v12 }
 0x16a   : > { %326 = vperm.xlu1 %516, %v322_v49   ;;  %331 = vperm.xlu0 %517, %v323_v50  }
 0x16f   : > { %v269_v51 = vpop.permute.xlu1 %268 }
 0x170   : > { %v276_v53 = vmul.f32 %v269_v51, %v766_v0  ;;  %v277_v54 = vmul.f32 %v269_v51, %v768_v1 }
 0x173   : > { %v274_v52 = vpop.permute.xlu1 %273 }
 0x174   : > { %v278_v55 = vmul.f32 %v274_v52, %v770_v2  ;;  %v279_v56 = vmul.f32 %v274_v52, %v778_v6 }
 0x1e0   : > { %v288_v57 = vpop.permute.xlu1 %287  ;;  %v283_v58 = vpop.permute.xlu0 %282 }
 0x1e1   : > { %v292_v59 = vadd.f32 %v288_v57, %v278_v55  ;;  %v293_v60 = vadd.f32 %v288_v57, %v279_v56  ;;  %v290_v61 = vadd.f32 %v283_v58, %v276_v53  ;;  %v291_v62 = vadd.f32 %v283_v58, %v277_v54 }
 0x1e3   : > { %v296_v63 = vsub.f32 0.0, %v292_v59  ;;  %v297_v3 = vsub.f32 0.0, %v293_v60  ;;  %v294_v4 = vsub.f32 0.0, %v290_v61  ;;  %v295_v5 = vsub.f32 0.0, %v291_v62 }
 0x1e5   : > { %v302_v7 = vmul.f32 1.442695, %v296_v63  ;;  %v304_v8 = vmul.f32 1.442695, %v297_v3  ;;  %v298_v9 = vmul.f32 1.442695, %v294_v4  ;;  %v332_v16 = vpop.permute.xlu0 %331  ;;  %v327_v20 = vpop.permute.xlu1 %326 }
 0x1e6   : > { %v300_v0 = vmul.f32 1.442695, %v295_v5 }
 0x1e7   : > { %520 = vpow2.f32 %v302_v7 }
 0x1e8   : > { %522 = vpow2.f32 %v304_v8 }
 0x1e9   : > { %524 = vpow2.f32 %v298_v9 }
 0x1ea   : > { %526 = vpow2.f32 %v300_v0 }
 0x1f4   : > { %v521_v1 = vpop.eup %520 }
 0x1f5   : > { %v523_v2 = vpop.eup %522  ;;  %v308_v6 = vadd.f32 1.0, %v521_v1 }
 0x1f6   : > { %v525_v10 = vpop.eup %524  ;;  %v309_v11 = vadd.f32 1.0, %v523_v2 }
 0x1f7   : > { %v527_v12 = vpop.eup %526  ;;  %528 = vrcp.f32 %v308_v6  ;;  %v306_v13 = vadd.f32 1.0, %v525_v10 }
 0x1f8   : > { %530 = vrcp.f32 %v309_v11  ;;  %v307_v14 = vadd.f32 1.0, %v527_v12 }
 0x1f9   : > { %532 = vrcp.f32 %v306_v13 }
 0x1fa   : > { %534 = vrcp.f32 %v307_v14 }
 0x204   : > { %v529_v15 = vpop.eup %528 }
 0x205   : > { %v531_v17 = vpop.eup %530  ;;  %v320_v18 = vmul.f32 %v529_v15, %v292_v59 }
 0x206   : > { %v533_v19 = vpop.eup %532  ;;  %v321_v21 = vmul.f32 %v531_v17, %v293_v60 }
 0x207   : > { %v535_v22 = vpop.eup %534  ;;  %v318_v23 = vmul.f32 %v533_v19, %v290_v61  ;;  %v336_v24 = vadd.f32 %v332_v16, %v320_v18 }
 0x208   : > { %v319_v25 = vmul.f32 %v535_v22, %v291_v62  ;;  %v337_v26 = vadd.f32 %v332_v16, %v321_v21 }
 0x209   : > { %v334_v27 = vadd.f32 %v327_v20, %v318_v23  ;;  %340 = vst [vmem:[%s203_s27 + $0x10] sm:$0xff] %v336_v24 }
 0x20a   : > { %v335_v28 = vadd.f32 %v327_v20, %v319_v25  ;;  %341 = vst [vmem:[%s203_s27 + $0x18] sm:$0xff] %v337_v26 }
 0x20b   : > { %338 = vst [vmem:[%s203_s27] sm:$0xff] %v334_v27 }
 0x20c   : > { %339 = vst [vmem:[%s203_s27 + $0x8] sm:$0xff] %v335_v28 }
 0x20d   : > { %577 = shalt.err (!%p574_p0)
}
 0x20e   : > { %s578_s7 = scalar_lea.hbm %s809_s10, 512  ;;  %s582_s19 = scalar_lea.hbm %s855_s3, 1024 }
 0x20f   : > { %p579_p2 = scmp.ne.s32.totalorder %s809_s10, %s578_s7  ;;  %p583_p3 = scmp.lt.s32.totalorder %s809_s10, %s855_s3 }
 0x210   : > { %p584_p6 = scmp.lt.s32.totalorder %s582_s19, %s578_s7 }
 0x211   : > { %p580_p9 = pnand %p579_p2, %p864_p13 }
 0x212   : > { %p585_p11 = por %p584_p6, %p583_p3 }
 0x213   : > { %p581_p1 = pneg %p580_p9 }
 0x215   : > { %p586_p12 = pnand %p585_p11, %p581_p1 }
 0x217   : > { %589 = shalt.err (!%p586_p12)
}
 0x218   : > { %s637_s26 = smov 256   ;;  %s638_s27 = smov 16  }
 0x219   : > { %462 = dma.vmem_to_hbm [thread:$0]  (%p864_p13), %s804_s28, 512, %s809_s10, %s343_s16, %s637_s26, %s637_s26, %s638_s27  }
 0x21a PF: > { %s371_s29 = sand.u32 1, %s616_s12   ;;  %p865_p4 = scmp.ne.s32.totalorder %s861_s25, 0 }
 0x21b   : > { %p866_p5 = scmp.ge.s32.totalorder %s628_s15, 2  ;;  %s372_s30 = scalar_lea.sflag [#allocation4], %s371_s29 }
 0x21d   : > { %p469_p7 = pnand %p866_p5, %p865_p4 }
 0x21f   : > { %p470_p8 = pneg %p469_p7 }
 0x221   : > { %611 = dma.done.wait (%p470_p8), %s372_s30, 512  }
 0x222   : > { %613 = vsyncadd (%p470_p8), %s372_s30, 4294966784  ;;  %p16_p10 = scmp.ge.s32.totalorder %s684_s18, 4   ;;  %s867_s12 = smov %s620_s13 }
 0x223   : > { %s868_s13 = smov %s624_s14  ;;  %s869_s14 = smov %s696_s21 }
 0x224   : > { %s870_s15 = smov %s684_s18  ;;  %18 = sbr.rel (!%p16_p10) target bundleno = 5 (0x5), region = 80 }
 0x229   :  { %377 = vsyncpa [#allocation3], 1 }
 0x22a   :  { %379 = vsyncpa [#allocation3 + $0x1], 1 }
 0x22b   :  { %380 = vsyncpa [#allocation4], 1 }
 0x22c   :  { %382 = vsyncpa [#allocation4 + $0x1], 1 }

</bundles_post_ra>
